<compile_context>
chip_gen: v6e
topology: v6e:2x2x1
jax: 0.10.0
libtpu: 0.0.40
codegen_flags: <defaults>
</compile_context>

<pallas_src>
import jax
import jax.numpy as jnp
from jax.experimental import pallas as pl
from jax.experimental.pallas import tpu as pltpu


def _mlp_kernel(x_ref, w1_ref, b1_ref, w2_ref, b2_ref, w3_ref, b3_ref, o_ref):
    # One (TILE_B, D) batch tile. Matmuls run on the MXU in the streamed dtype
    # (f32 or bf16) with f32 accumulation; elementwise math stays in f32.
    x = x_ref[...]

    # layer1: Linear(D, D) + ReLU
    h1 = jnp.dot(x, w1_ref[...], preferred_element_type=jnp.float32)
    h1 = jnp.maximum(h1 + b1_ref[...], 0.0)

    # layer2: Linear(D, 2D) + ReLU
    h2 = jnp.dot(h1.astype(w2_ref.dtype), w2_ref[...],
                 preferred_element_type=jnp.float32)
    h2 = jnp.maximum(h2 + b2_ref[...], 0.0)

    # layer3: Linear(2D, O) + ReLU (the PyTorch module really does apply ReLU here)
    h3 = jnp.dot(h2.astype(w3_ref.dtype), w3_ref[...],
                 preferred_element_type=jnp.float32)
    h3 = jnp.maximum(h3 + b3_ref[...], 0.0)

    # final sigmoid (EUP)
    o_ref[...] = jax.nn.sigmoid(h3).astype(o_ref.dtype)


def binary_classifier_forward(x, params, *, tile_b=512, compute_dtype=jnp.float32):
    """Fused 3-layer MLP forward.

    x: (B, D) float32.
    tile_b: batch tile size (rows per grid step). Larger tiles amortize the
            ~0.35us per-step overhead (favor 1024-2048 on v5e/v6e's 128 MiB
            VMEM, ~512 on v7x's 64 MiB). Clamped to B for small batches.
    compute_dtype: dtype x and the weight matrices are streamed/matmul'd in
            (jnp.float32 or jnp.bfloat16). Accumulation and all elementwise
            math (bias, ReLU, sigmoid) stay in float32.
    """
    w1, b1, w2, b2, w3, b3 = params
    B, D = x.shape
    O = w3.shape[1]

    # Stream x and weights in compute_dtype; biases stay f32 (they are tiny
    # and the bias-add / activations run in f32 on the VPU/EUP).
    x_c = x.astype(compute_dtype)
    w1_c, w2_c, w3_c = (w.astype(compute_dtype) for w in (w1, w2, w3))
    b1_f, b2_f, b3_f = (b.astype(jnp.float32) for b in (b1, b2, b3))

    tile_b = int(min(tile_b, B))
    num_tiles = pl.cdiv(B, tile_b)
    b_pad = num_tiles * tile_b
    if b_pad != B:
        # Pad the batch so every grid step sees a full tile; padded rows are
        # independent garbage and sliced off below.
        x_c = jnp.pad(x_c, ((0, b_pad - B), (0, 0)))

    # Constant index_map: block == whole array, fetched once and kept
    # VMEM-resident across all batch tiles.
    const = lambda a: pl.BlockSpec(a.shape, lambda i: (0,) * a.ndim)

    out = pl.pallas_call(
        _mlp_kernel,
        out_shape=jax.ShapeDtypeStruct((b_pad, O), jnp.float32),
        grid=(num_tiles,),
        in_specs=[
            pl.BlockSpec((tile_b, D), lambda i: (i, 0)),   # x: tiled over batch
            const(w1_c), const(b1_f),
            const(w2_c), const(b2_f),
            const(w3_c), const(b3_f),
        ],
        out_specs=pl.BlockSpec((tile_b, O), lambda i: (i, 0)),
        compiler_params=pltpu.CompilerParams(
            # Batch tiles are independent -> shard across TCs on v7x megacore.
            dimension_semantics=("parallel",),
        ),
    )(x_c, w1_c, b1_f, w2_c, b2_f, w3_c, b3_f)

    if b_pad != B:
        out = out[:B]
    return out


def init_params(key, input_shape, out_shape):
    """Deterministic init matching the PyTorch module's layer shapes.

    PyTorch nn.Linear(in, out) holds weight (out, in); we store the transpose
    (in, out) so the kernel computes x @ W + b directly.
    """
    k1, k2, k3, k4, k5, k6 = jax.random.split(key, 6)
    D, H2, O = input_shape, input_shape * 2, out_shape
    scale = lambda fan_in: 1.0 / jnp.sqrt(jnp.float32(fan_in))
    w1 = jax.random.uniform(k1, (D, D), jnp.float32, -1, 1) * scale(D)
    b1 = jax.random.uniform(k2, (1, D), jnp.float32, -1, 1) * scale(D)
    w2 = jax.random.uniform(k3, (D, H2), jnp.float32, -1, 1) * scale(D)
    b2 = jax.random.uniform(k4, (1, H2), jnp.float32, -1, 1) * scale(D)
    w3 = jax.random.uniform(k5, (H2, O), jnp.float32, -1, 1) * scale(H2)
    b3 = jax.random.uniform(k6, (1, O), jnp.float32, -1, 1) * scale(H2)
    return (w1, b1, w2, b2, w3, b3)


def reference_forward(x, params):
    w1, b1, w2, b2, w3, b3 = params
    h1 = jnp.maximum(x @ w1 + b1, 0.0)
    h2 = jnp.maximum(h1 @ w2 + b2, 0.0)
    h3 = jnp.maximum(h2 @ w3 + b3, 0.0)
    return jax.nn.sigmoid(h3)


if __name__ == "__main__":
    key = jax.random.PRNGKey(0)
    kx, kp = jax.random.split(key)

    batch = 8
    input_shape = 32   # feature dim of the MLP
    out_shape = 4      # classifier output dim

    x = jax.random.normal(kx, (batch, input_shape), dtype=jnp.float32)
    params = init_params(kp, input_shape, out_shape)
    ref = reference_forward(x, params)

    # f32 path (tight tolerance).
    out = jax.block_until_ready(binary_classifier_forward(x, params))
    assert out.shape == (batch, out_shape), out.shape
    assert jnp.allclose(out, ref, atol=1e-5, rtol=1e-5), "f32 mismatch vs reference"

    # bf16-streamed path (halves HBM bytes for x; looser tolerance vs f32 ref).
    out_bf16 = jax.block_until_ready(
        binary_classifier_forward(x, params, compute_dtype=jnp.bfloat16))
    assert out_bf16.shape == (batch, out_shape), out_bf16.shape
    assert jnp.allclose(out_bf16, ref, atol=3e-2, rtol=3e-2), "bf16 mismatch vs reference"

    # Larger, non-divisible batch to exercise the tiled/pipelined + padding path.
    x_big = jax.random.normal(kx, (1000, input_shape), dtype=jnp.float32)
    ref_big = reference_forward(x_big, params)
    out_big = jax.block_until_ready(
        binary_classifier_forward(x_big, params, tile_b=512))
    assert out_big.shape == (1000, out_shape), out_big.shape
    assert jnp.allclose(out_big, ref_big, atol=1e-5, rtol=1e-5), "tiled mismatch vs reference"

    print("KERNEL_OK")
</pallas_src>

<mosaic_0001>
module attributes {stable_mosaic.version = 11 : i64} {
  func.func @_mlp_kernel(%arg0: i32, %arg1: memref<8x32xf32, #tpu.memory_space<vmem>>, %arg2: memref<32x32xf32, #tpu.memory_space<vmem>>, %arg3: memref<1x32xf32, #tpu.memory_space<vmem>>, %arg4: memref<32x64xf32, #tpu.memory_space<vmem>>, %arg5: memref<1x64xf32, #tpu.memory_space<vmem>>, %arg6: memref<64x4xf32, #tpu.memory_space<vmem>>, %arg7: memref<1x4xf32, #tpu.memory_space<vmem>>, %arg8: memref<8x4xf32, #tpu.memory_space<vmem>>) attributes {dimension_semantics = [#tpu.dimension_semantics<parallel>], iteration_bounds = array<i64: 1>, scalar_prefetch = 0 : i64, scratch_operands = 0 : i64, tpu.core_type = #tpu.core_type<tc>, window_params = [{transform_indices = @transform_0, window_bounds = array<i64: 8, 32>}, {pipeline_mode = #tpu.pipeline_mode<synchronous>, transform_indices = @transform_1, window_bounds = array<i64: 32, 32>}, {pipeline_mode = #tpu.pipeline_mode<synchronous>, transform_indices = @transform_2, window_bounds = array<i64: 1, 32>}, {pipeline_mode = #tpu.pipeline_mode<synchronous>, transform_indices = @transform_3, window_bounds = array<i64: 32, 64>}, {pipeline_mode = #tpu.pipeline_mode<synchronous>, transform_indices = @transform_4, window_bounds = array<i64: 1, 64>}, {pipeline_mode = #tpu.pipeline_mode<synchronous>, transform_indices = @transform_5, window_bounds = array<i64: 64, 4>}, {pipeline_mode = #tpu.pipeline_mode<synchronous>, transform_indices = @transform_6, window_bounds = array<i64: 1, 4>}, {transform_indices = @transform_7, window_bounds = array<i64: 8, 4>}]} {
    %c0 = arith.constant 0 : index
    %c0_0 = arith.constant 0 : index
    %0 = vector.load %arg1[%c0, %c0_0] : memref<8x32xf32, #tpu.memory_space<vmem>>, vector<8x32xf32>
    %c0_1 = arith.constant 0 : index
    %c0_2 = arith.constant 0 : index
    %1 = vector.load %arg2[%c0_1, %c0_2] : memref<32x32xf32, #tpu.memory_space<vmem>>, vector<32x32xf32>
    %cst = arith.constant dense<0.000000e+00> : vector<8x32xf32>
    %2 = tpu.matmul %0, %1, %cst {dimension_numbers = #tpu.dot_dimension_numbers<[1], [0], [0], [1], [0, 0, 1, 1], [], []>} : vector<8x32xf32>, vector<32x32xf32>, vector<8x32xf32> -> vector<8x32xf32>
    %c0_3 = arith.constant 0 : index
    %c0_4 = arith.constant 0 : index
    %3 = vector.load %arg3[%c0_3, %c0_4] : memref<1x32xf32, #tpu.memory_space<vmem>>, vector<1x32xf32>
    %4 = vector.broadcast %3 : vector<1x32xf32> to vector<8x32xf32>
    %5 = arith.addf %2, %4 : vector<8x32xf32>
    %cst_5 = arith.constant 0.000000e+00 : f32
    %6 = vector.broadcast %cst_5 : f32 to vector<8x32xf32>
    %7 = arith.maximumf %5, %6 : vector<8x32xf32>
    %c0_6 = arith.constant 0 : index
    %c0_7 = arith.constant 0 : index
    %8 = vector.load %arg4[%c0_6, %c0_7] : memref<32x64xf32, #tpu.memory_space<vmem>>, vector<32x64xf32>
    %cst_8 = arith.constant dense<0.000000e+00> : vector<8x64xf32>
    %9 = tpu.matmul %7, %8, %cst_8 {dimension_numbers = #tpu.dot_dimension_numbers<[1], [0], [0], [1], [0, 0, 1, 1], [], []>} : vector<8x32xf32>, vector<32x64xf32>, vector<8x64xf32> -> vector<8x64xf32>
    %c0_9 = arith.constant 0 : index
    %c0_10 = arith.constant 0 : index
    %10 = vector.load %arg5[%c0_9, %c0_10] : memref<1x64xf32, #tpu.memory_space<vmem>>, vector<1x64xf32>
    %11 = vector.broadcast %10 : vector<1x64xf32> to vector<8x64xf32>
    %12 = arith.addf %9, %11 : vector<8x64xf32>
    %cst_11 = arith.constant 0.000000e+00 : f32
    %13 = vector.broadcast %cst_11 : f32 to vector<8x64xf32>
    %14 = arith.maximumf %12, %13 : vector<8x64xf32>
    %c0_12 = arith.constant 0 : index
    %c0_13 = arith.constant 0 : index
    %15 = vector.load %arg6[%c0_12, %c0_13] : memref<64x4xf32, #tpu.memory_space<vmem>>, vector<64x4xf32>
    %cst_14 = arith.constant dense<0.000000e+00> : vector<8x4xf32>
    %16 = tpu.matmul %14, %15, %cst_14 {dimension_numbers = #tpu.dot_dimension_numbers<[1], [0], [0], [1], [0, 0, 1, 1], [], []>} : vector<8x64xf32>, vector<64x4xf32>, vector<8x4xf32> -> vector<8x4xf32>
    %c0_15 = arith.constant 0 : index
    %c0_16 = arith.constant 0 : index
    %17 = vector.load %arg7[%c0_15, %c0_16] : memref<1x4xf32, #tpu.memory_space<vmem>>, vector<1x4xf32>
    %18 = vector.broadcast %17 : vector<1x4xf32> to vector<8x4xf32>
    %19 = arith.addf %16, %18 : vector<8x4xf32>
    %cst_17 = arith.constant 0.000000e+00 : f32
    %20 = vector.broadcast %cst_17 : f32 to vector<8x4xf32>
    %21 = arith.maximumf %19, %20 : vector<8x4xf32>
    %22 = arith.negf %21 : vector<8x4xf32>
    %23 = math.exp %22 : vector<8x4xf32>
    %cst_18 = arith.constant 1.000000e+00 : f32
    %24 = vector.broadcast %cst_18 : f32 to vector<8x4xf32>
    %25 = arith.addf %24, %23 : vector<8x4xf32>
    %26 = arith.divf %24, %25 : vector<8x4xf32>
    %c0_19 = arith.constant 0 : index
    %c0_20 = arith.constant 0 : index
    %27 = vector.load %arg8[%c0_19, %c0_20] : memref<8x4xf32, #tpu.memory_space<vmem>>, vector<8x4xf32>
    tpu.vector_store %arg8[%c0_19, %c0_20], %26 {strides = array<i32>} : memref<8x4xf32, #tpu.memory_space<vmem>>, vector<8x4xf32>,
    return
  }
  func.func @transform_0(%arg0: i32) -> (i32, i32) {
    %c0_i32 = arith.constant 0 : i32
    %c0_i32_0 = arith.constant 0 : i32
    return %arg0, %c0_i32 : i32, i32
  }
  func.func @transform_1(%arg0: i32) -> (i32, i32) {
    %c0_i32 = arith.constant 0 : i32
    %c0_i32_0 = arith.constant 0 : i32
    %c0_i32_1 = arith.constant 0 : i32
    return %c0_i32, %c0_i32_0 : i32, i32
  }
  func.func @transform_2(%arg0: i32) -> (i32, i32) {
    %c0_i32 = arith.constant 0 : i32
    %c0_i32_0 = arith.constant 0 : i32
    %c0_i32_1 = arith.constant 0 : i32
    return %c0_i32, %c0_i32_0 : i32, i32
  }
  func.func @transform_3(%arg0: i32) -> (i32, i32) {
    %c0_i32 = arith.constant 0 : i32
    %c0_i32_0 = arith.constant 0 : i32
    %c0_i32_1 = arith.constant 0 : i32
    return %c0_i32, %c0_i32_0 : i32, i32
  }
  func.func @transform_4(%arg0: i32) -> (i32, i32) {
    %c0_i32 = arith.constant 0 : i32
    %c0_i32_0 = arith.constant 0 : i32
    %c0_i32_1 = arith.constant 0 : i32
    return %c0_i32, %c0_i32_0 : i32, i32
  }
  func.func @transform_5(%arg0: i32) -> (i32, i32) {
    %c0_i32 = arith.constant 0 : i32
    %c0_i32_0 = arith.constant 0 : i32
    %c0_i32_1 = arith.constant 0 : i32
    return %c0_i32, %c0_i32_0 : i32, i32
  }
  func.func @transform_6(%arg0: i32) -> (i32, i32) {
    %c0_i32 = arith.constant 0 : i32
    %c0_i32_0 = arith.constant 0 : i32
    %c0_i32_1 = arith.constant 0 : i32
    return %c0_i32, %c0_i32_0 : i32, i32
  }
  func.func @transform_7(%arg0: i32) -> (i32, i32) {
    %c0_i32 = arith.constant 0 : i32
    %c0_i32_0 = arith.constant 0 : i32
    return %arg0, %c0_i32 : i32, i32
  }
}

</mosaic_0001>

<bundles_post_ra>
// kernel: tpu_custom_call.1
= control target key start
LH: loop header
LB: loop body
LE: loop exit
PB: predicated region body
PF: predicated region fallthrough
CT: control target
= control target key end

     0   :  { %12 = vsyncpa [#allocation3], 0  ;;  %s409_s24 = smov [#allocation2]   ;;  %s520_s0 = inlined_call_operand.hbm [shape: f32[8,32], index: 0, kind: input, shape index: {}]   ;;  %s521_s1 = inlined_call_operand.vmem [shape: f32[32,32], index: 1, kind: input, shape index: {}]   ;;  %s522_s2 = inlined_call_operand.vmem [shape: f32[1,32], index: 2, kind: input, shape index: {}]   ;;  %s523_s3 = inlined_call_operand.vmem [shape: f32[32,64], index: 3, kind: input, shape index: {}]   ;;  %s524_s4 = inlined_call_operand.vmem [shape: f32[1,64], index: 4, kind: input, shape index: {}]   ;;  %s525_s5 = inlined_call_operand.vmem [shape: f32[64,4], index: 5, kind: input, shape index: {}]   ;;  %s526_s6 = inlined_call_operand.vmem [shape: f32[1,4], index: 6, kind: input, shape index: {}]   ;;  %s527_s7 = inlined_call_operand.vmem [shape: f32[8,4], index: 7, kind: output, shape index: {}]  }
   0x1   :  { %s19_s25 = sshll.u32 %s409_s24, 4  ;;  %s20_s25 = int_to_ptr.vmem [resolvable:$true] %s19_s25 }
   0x2   :  { %s395_s26 = scalar_lea.vmem %s20_s25, 128  ;;  %p400_p1 = scmp.lt.s32.totalorder %s20_s25, %s20_s25 }
   0x3   :  { %p396_p0 = scmp.ne.s32.totalorder %s20_s25, %s395_s26  ;;  %p401_p2 = scmp.lt.s32.totalorder %s395_s26, %s395_s26 }
   0x5   :  { %p402_p3 = por %p401_p2, %p400_p1 }
   0x7   :  { %p403_p4 = pnand %p402_p3, %p396_p0 }
   0x9   :  { %406 = shalt.err (!%p403_p4)
}
   0xa   :  { %22 = dma.hbm_to_vmem [thread:$0]  %s520_s0, 128, %s20_s25, [#allocation3]  }
   0xb   :  { %407 = dma.done.wait [#allocation3], 128  }
   0xc   :  { %408 = vsyncadd [#allocation3], 4294967168  ;;  %v410_v0 = vmov 0.0   ;;  %vm411_vm0 = vmmov 0   ;;  %v42_v1 = vld [vmem:[%s521_s1 + $0x18] sm:$0xff]  ;;  %v41_v2 = vld [vmem:[%s521_s1 + $0x10] sm:$0xff] }
   0xd   :  { %339 = vmatprep.subr.mxu1 %v410_v0  ;;  %347 = vmatprep.mubr.msk.f32.mxu1 %vm411_vm0, %v410_v0  ;;  %v40_v3 = vld [vmem:[%s521_s1 + $0x8] sm:$0xff]  ;;  %v39_v4 = vld [vmem:[%s521_s1] sm:$0xff]  ;;  %vm50_vm1 = vcmask 261120   ;;  %v128_v6 = vld [vmem:[%s523_s3 + $0x18] sm:$0xff]  ;;  %vm225_vm2 = vcmask 523264   ;;  %vm306_vm3 = vcmask 31744  }
   0xe   :  { %361 = vmatprep.subr.mxu0 %v410_v0  ;;  %377 = vmatprep.mubr.msk.f32.mxu0 %vm411_vm0, %v410_v0  ;;  %v38_v5 = vld [vmem:[#allocation2] sm:$0xff]  ;;  %v127_v7 = vld [vmem:[%s523_s3 + $0x10] sm:$0xff]  ;;  %v126_v8 = vld [vmem:[%s523_s3 + $0x8] sm:$0xff] }
   0xf   :  { %340 = vmatpush3.msra.mxu1 %v42_v1  ;;  %v125_v9 = vld [vmem:[%s523_s3] sm:$0xff]  ;;  %v217_v10 = vld [vmem:[%s525_s5 + $0x38] sm:$0xff]  ;;  %v216_v11 = vld [vmem:[%s525_s5 + $0x30] sm:$0xff] }
  0x10   :  { %341 = vmatprep.subr.mxu1 %v410_v0  ;;  %362 = vmatpush3.msra.mxu0 %v217_v10  ;;  %v215_v12 = vld [vmem:[%s525_s5 + $0x28] sm:$0xff]  ;;  %v214_v13 = vld [vmem:[%s525_s5 + $0x20] sm:$0xff]  ;;  %v213_v14 = vld [vmem:[%s525_s5 + $0x18] sm:$0xff] }
  0x11   :  { %342 = vmatpush3.msra.mxu1 %v41_v2  ;;  %363 = vmatprep.subr.mxu0 %v410_v0  ;;  %v313_v15 = vld [vmem:[%s522_s2] ss:$0 sm:$0xff]  ;;  %v212_v20 = vld [vmem:[%s525_s5 + $0x10] sm:$0xff]  ;;  %v211_v21 = vld [vmem:[%s525_s5 + $0x8] sm:$0xff] }
  0x12   :  { %343 = vmatprep.subr.mxu1 %v410_v0  ;;  %364 = vmatpush3.msra.mxu0 %v216_v11  ;;  %v210_v22 = vld [vmem:[%s525_s5] sm:$0xff] }
  0x13   :  { %344 = vmatpush3.msra.mxu1 %v40_v3  ;;  %365 = vmatprep.subr.mxu0 %v410_v0  ;;  %v315_v23 = vld [vmem:[%s524_s4] ss:$0 sm:$0xff] }
  0x14   :  { %345 = vmatprep.subr.mxu1 %v410_v0  ;;  %366 = vmatpush3.msra.mxu0 %v215_v12  ;;  %v317_v28 = vld [vmem:[%s526_s6] ss:$0 sm:$0xff] }
  0x15   :  { %346 = vmatpush3.msra.mxu1 %v39_v4  ;;  %367 = vmatprep.subr.mxu0 %v410_v0 }
  0x16   :  { %348 = vmatmul.mubr.msk.f32.vlgmr.msra.gmra.mxu1 %vm50_vm1, %v38_v5  ;;  %350 = vmatprep.subr.mxu1 %v410_v0 }
  0x17   :  { %351 = vmatpush3.msra.mxu1 %v128_v6  ;;  %358 = vmatprep.mubr.msk.f32.mxu1 %vm411_vm0, %v410_v0 }
  0x18   :  { %352 = vmatprep.subr.mxu1 %v410_v0  ;;  %368 = vmatpush3.msra.mxu0 %v214_v13 }
  0x19   :  { %353 = vmatpush3.msra.mxu1 %v127_v7  ;;  %369 = vmatprep.subr.mxu0 %v410_v0 }
  0x1a   :  { %354 = vmatprep.subr.mxu1 %v410_v0  ;;  %370 = vmatpush3.msra.mxu0 %v213_v14 }
  0x1b   :  { %355 = vmatpush3.msra.mxu1 %v126_v8  ;;  %371 = vmatprep.subr.mxu0 %v410_v0 }
  0x1c   :  { %356 = vmatprep.subr.mxu1 %v410_v0  ;;  %372 = vmatpush3.msra.mxu0 %v212_v20 }
  0x1d   :  { %357 = vmatpush3.msra.mxu1 %v125_v9  ;;  %373 = vmatprep.subr.mxu0 %v410_v0 }
  0x1e   :  { %374 = vmatpush3.msra.mxu0 %v211_v21 }
  0x1f   :  { %375 = vmatprep.subr.mxu0 %v410_v0 }
  0x20   :  { %376 = vmatpush3.msra.mxu0 %v210_v22 }
  0xd6   :  { %v120_v16 = vpop.f32.mrf.mxu1 }
  0xd7   :  { %v121_v17 = vadd.f32 %v313_v15, %v120_v16 }
  0xd8   :  { %v349_v18 = vpop.f32.mrf.mxu1 }
  0xd9   :  { %v124_v19 = vmax.f32 %v121_v17, 0.0 }
  0xdb   :  { %359 = vmatmul.mubr.msk.f32.vlgmr.msra.gmra.mxu1 %vm50_vm1, %v124_v19 }
 0x19b   :  { %v205_v24 = vpop.f32.mrf.mxu1 }
 0x19c   :  { %v206_v25 = vadd.f32 %v315_v23, %v205_v24 }
 0x19d   :  { %v360_v26 = vpop.f32.mrf.mxu1 }
 0x19e   :  { %v209_v27 = vmax.f32 %v206_v25, 0.0 }
 0x1a0   :  { %378 = vmatmul.mubr.msk.f32.vlgmr.msra.gmra.mxu0 %vm225_vm2, %v209_v27 }
 0x260   :  { %v295_v29 = vpop.f32.mrf.mxu0 }
 0x261   :  { %v296_v30 = vadd.f32 %v317_v28, %v295_v29 }
 0x262   :  { %v379_v31 = vpop.f32.mrf.mxu0 }
 0x263   :  { %v299_v32 = vmax.f32 %v296_v30, 0.0 }
 0x265   :  { %v319_v33 = vmul.f32 -1.442695, %v299_v32 }
 0x267   :  { %383 = vpow2.f32 %v319_v33 }
 0x274   :  { %v384_v34 = vpop.eup %383 }
 0x275   :  { %v303_v35 = vadd.f32 1.0, %v384_v34 }
 0x277   :  { %385 = vrcp.f32 %v303_v35 }
 0x284   :  { %v386_v36 = vpop.eup %385 }
 0x285   :  { %307 = vst.msk [vmem:[%s527_s7] sm:$0xff] %vm306_vm3, %v386_v36 }
 0x286   :  { %312 = vsyncpa [#allocation3], 1 }

</bundles_post_ra>
